<compile_context>
chip_gen: v5e
topology: v5e:2x2
jax: 0.10.0
libtpu: 0.0.40
codegen_flags: <defaults>
</compile_context>

<pallas_src>
import functools

import jax
import jax.numpy as jnp
from jax.experimental import pallas as pl
from jax.experimental.pallas import tpu as pltpu


# Packed sublane multiple per dtype itemsize (f32 -> 8, bf16 -> 16, int8 -> 32).
_SUBLANE = {4: 8, 2: 16, 1: 32}


def _device_kind():
    try:
        return jax.devices()[0].device_kind.lower()
    except Exception:
        return ""


def _target_tile_bytes(kind):
    """Per-generation tile target: keep the 0.35us/step fixed cost amortized
    while the ~4x-tile pipeline footprint stays well under the VMEM budget."""
    if "v7" in kind:
        return 8 << 20     # ~3.2 TB/s HBM: needs big tiles; 4x8=32 MiB << 64 MiB phys
    if "v6" in kind:
        return 4 << 20     # measured 85% -> 86% of roofline going 1 -> 4 MiB
    if "v5" in kind:
        return 2 << 20     # ~0.82 TB/s: 1-2 MiB already saturates; 16 MiB scoped default
    return 2 << 20         # conservative default for unknown chips


def _dimension_semantics(kind, grid_rows):
    """Plain "parallel" does not reliably engage both v7x TensorCores; only
    core-parallel semantics change codegen.  Falls back to "parallel" if
    lowering rejects it (see the try/except in vdp_forward)."""
    if "v7" in kind and grid_rows > 1 and hasattr(pltpu, "CORE_PARALLEL"):
        return (pltpu.CORE_PARALLEL,)
    return ("parallel",)


def _vdp_kernel(z_ref, out_ref, *, mu):
    """z_ref / out_ref: (TR, TC) tile of the flat interleaved [x, v, x, v, ...] view."""
    z = z_ref[...]
    zf = z.astype(jnp.float32)          # f32 compute; free since kernel is mem-bound
    tc = z.shape[-1]                    # static, even (multiple of 128)

    # Lane-neighbour fetches via XLU rotations (pairs never straddle a tile,
    # so the circular wrap never lands on a selected lane).
    right = pltpu.roll(zf, tc - 1, 1)   # right[i] = zf[i + 1]: the v partner at even lanes
    left = pltpu.roll(zf, 1, 1)         # left[i]  = zf[i - 1]: the x partner at odd lanes

    lane = jax.lax.broadcasted_iota(jnp.int32, z.shape, 1)
    is_even = (lane & 1) == 0           # single VALU AND instead of integer modulo

    # even lanes (x slots of the input -> out[..., 0]) : v
    # odd  lanes (v slots of the input -> out[..., 1]) : mu * (1 - x^2) * v - x
    dv = mu * (1.0 - left * left) * zf - left
    out_ref[...] = jnp.where(is_even, right, dv).astype(out_ref.dtype)


def _vdp_pure(pairs, mu, out_dtype):
    """Plain-JAX RHS on an (N, 2) array (used for tiny inputs / ragged tails).
    Computed in f32 like the kernel for numerical consistency."""
    x = pairs[..., 0].astype(jnp.float32)
    v = pairs[..., 1].astype(jnp.float32)
    return jnp.stack((v, mu * (1.0 - x * x) * v - x), axis=-1).astype(out_dtype)


def vdp_forward(t, y, mu, *, lane_block=1024, tile_bytes=None, input_buffers=2):
    """Pallas implementation of VdP.forward(t, y).

    Args:
      t:   unused scalar time (kept for API parity with the PyTorch module).
      y:   array of shape (..., 2), last axis = (x, v) state.
      mu:  python float damping parameter (baked in statically).
      lane_block: max lane width of the 2D view (multiple of 128).
      tile_bytes: optional override of the per-tile byte target.
      input_buffers: pipeline depth for the input stream (2 = double buffer);
        bump to 3 only if a trace shows exposed input DMA and VMEM has headroom.

    Returns:
      array of shape (..., 2): stack((v, mu*(1-x^2)*v - x), axis=-1)
    """
    del t  # not used by the VdP RHS, same as the PyTorch module
    if y.shape[-1] != 2:
        raise ValueError("last axis of y must be 2 (state = (x, v))")
    # TODO(synk): a traced/array `mu` would need a scalar-prefetch SMEM arg;
    # here it is baked statically like the PyTorch module's float attribute.
    mu = float(mu)

    orig_shape = y.shape
    dtype = y.dtype
    itemsize = jnp.dtype(dtype).itemsize
    sub = _SUBLANE.get(itemsize, 8)

    total = y.size                       # always even (last dim == 2)
    flat = y.reshape(-1)                 # free: contiguous row-major reshape

    # ---- lane width C ------------------------------------------------------
    # Prefer the largest multiple of 128 (<= lane_block) dividing `total`
    # (no ragged tail at all); otherwise take the largest 128-multiple and
    # handle the < C tail in plain JAX.
    lane_block = max(128, (lane_block // 128) * 128)
    C = 0
    cand = (min(lane_block, total) // 128) * 128
    while cand >= 128:
        if total % cand == 0:
            C = cand
            break
        cand -= 128
    if C == 0 and total >= 128:
        C = (min(lane_block, total) // 128) * 128

    if C == 0:
        # Tiny inputs (< 128 elements): a lane-dense kernel launch isn't worth it.
        return _vdp_pure(flat.reshape(-1, 2), mu, dtype).reshape(orig_shape)

    main = (total // C) * C              # C is even, so (x, v) pairs never split here
    tail = total - main
    R = main // C

    # ---- row tile TR (dtype-aware sublane multiple) --------------------------
    kind = _device_kind()
    tb = int(tile_bytes) if tile_bytes else _target_tile_bytes(kind)
    rows_target = max(sub, tb // (C * itemsize))
    if rows_target >= R:
        TR = R                            # full extent: always a legal block
    else:
        TR = max(sub, (rows_target // sub) * sub)
        TR = min(TR, R)

    grid_rows = pl.cdiv(R, TR)
    tile_actual = TR * C * itemsize
    # in-buffers + 2 out-buffers of tile_actual, plus headroom; clamp to stay
    # comfortably under every chip's physical VMEM (64 MiB on v7x).
    footprint = (input_buffers + 2) * tile_actual
    vmem_limit = int(min(max(footprint + (8 << 20), 16 << 20), 48 << 20))

    z2d = (flat if main == total else flat[:main]).reshape(R, C)

    in_spec_kwargs = {}
    if input_buffers != 2 and hasattr(pl, "Buffered"):
        in_spec_kwargs["pipeline_mode"] = pl.Buffered(int(input_buffers))

    def _call(dim_sem):
        return pl.pallas_call(
            functools.partial(_vdp_kernel, mu=mu),
            out_shape=jax.ShapeDtypeStruct((R, C), dtype),
            grid=(grid_rows,),
            in_specs=[pl.BlockSpec((TR, C), lambda i: (i, 0), **in_spec_kwargs)],
            out_specs=pl.BlockSpec((TR, C), lambda i: (i, 0)),
            compiler_params=pltpu.CompilerParams(
                dimension_semantics=dim_sem,
                vmem_limit_bytes=vmem_limit),
        )(z2d)

    dim_sem = _dimension_semantics(kind, grid_rows)
    try:
        out2d = _call(dim_sem)
    except Exception:
        if dim_sem == ("parallel",):
            raise
        out2d = _call(("parallel",))      # safe fallback if CORE_PARALLEL is rejected

    out_flat = out2d.reshape(-1)
    if tail:
        tail_out = _vdp_pure(flat[main:].reshape(-1, 2), mu, dtype).reshape(-1)
        out_flat = jnp.concatenate([out_flat, tail_out])
    return out_flat.reshape(orig_shape)


def vdp_reference(t, y, mu):
    """Pure-JAX reference (mirrors the PyTorch forward exactly)."""
    del t
    x, v = y[..., 0], y[..., 1]
    return jnp.stack((v, mu * (1.0 - x ** 2) * v - x), axis=-1)


# TODO(synk): the PyTorch module's `self.nfe` call counter is Python-side
# mutable state, not a tensor op; it has no Pallas equivalent and is omitted.


if __name__ == "__main__":
    mu = 2.5
    t = jnp.float32(0.0)
    k1, k2, k3, k4, k5 = jax.random.split(jax.random.PRNGKey(0), 5)

    # (4, 16, 2): smallest lane-friendly shape (128 elements -> a single 1x128 tile).
    y1 = jax.random.normal(k1, (4, 16, 2), dtype=jnp.float32)
    o1 = jax.block_until_ready(vdp_forward(t, y1, mu))
    assert o1.shape == y1.shape and o1.dtype == y1.dtype
    assert jnp.allclose(o1, vdp_reference(t, y1, mu), atol=1e-6, rtol=1e-6), "y1 mismatch"

    # (100, 512, 2): multi-tile grid with a partial last row block
    # (tile_bytes override -> TR=8, R=100 -> 13 blocks, last one 4 rows).
    y2 = jax.random.normal(k2, (100, 512, 2), dtype=jnp.float32)
    o2 = jax.block_until_ready(vdp_forward(t, y2, mu, tile_bytes=32 * 1024))
    assert jnp.allclose(o2, vdp_reference(t, y2, mu), atol=1e-6, rtol=1e-6), "y2 mismatch"

    # (96, 256, 2) bf16: dtype-aware sublane rounding (TR multiple of 16), 3 tiles.
    y3 = jax.random.normal(k3, (96, 256, 2), dtype=jnp.bfloat16)
    o3 = jax.block_until_ready(vdp_forward(t, y3, mu, tile_bytes=32 * 1024))
    r3 = vdp_reference(t, y3.astype(jnp.float32), mu).astype(jnp.bfloat16)
    assert o3.dtype == jnp.bfloat16
    assert jnp.allclose(o3.astype(jnp.float32), r3.astype(jnp.float32),
                        atol=2e-2, rtol=2e-2), "y3 mismatch"

    # (5, 130, 2): lane-unfriendly total (1300) -> kernel prefix + plain-JAX tail,
    # no whole-array pad / post-slice.
    y4 = jax.random.normal(k4, (5, 130, 2), dtype=jnp.float32)
    o4 = jax.block_until_ready(vdp_forward(t, y4, mu))
    assert jnp.allclose(o4, vdp_reference(t, y4, mu), atol=1e-6, rtol=1e-6), "y4 mismatch"

    # (3, 7, 2): tiny (< 128 elements) -> plain-JAX fallback path.
    y5 = jax.random.normal(k5, (3, 7, 2), dtype=jnp.float32)
    o5 = jax.block_until_ready(vdp_forward(t, y5, mu))
    assert jnp.allclose(o5, vdp_reference(t, y5, mu), atol=1e-6, rtol=1e-6), "y5 mismatch"

    print("KERNEL_OK")
</pallas_src>

<mosaic_0001>
module attributes {stable_mosaic.version = 11 : i64} {
  func.func @_vdp_kernel(%arg0: i32, %arg1: memref<1x128xf32, #tpu.memory_space<vmem>>, %arg2: memref<1x128xf32, #tpu.memory_space<vmem>>) attributes {dimension_semantics = [#tpu.dimension_semantics<parallel>], iteration_bounds = array<i64: 1>, scalar_prefetch = 0 : i64, scratch_operands = 0 : i64, tpu.core_type = #tpu.core_type<tc>, window_params = [{transform_indices = @transform_0, window_bounds = array<i64: 1, 128>}, {transform_indices = @transform_1, window_bounds = array<i64: 1, 128>}]} {
    %c0 = arith.constant 0 : index
    %c0_0 = arith.constant 0 : index
    %0 = vector.load %arg1[%c0, %c0_0] : memref<1x128xf32, #tpu.memory_space<vmem>>, vector<1x128xf32>
    %c127_i32 = arith.constant 127 : i32
    %1 = tpu.dynamic_rotate %0 by %c127_i32 dim 1 : vector<1x128xf32>, i32 -> vector<1x128xf32>
    %c1_i32 = arith.constant 1 : i32
    %2 = tpu.dynamic_rotate %0 by %c1_i32 dim 1 : vector<1x128xf32>, i32 -> vector<1x128xf32>
    %3 = tpu.iota {dimensions = array<i32: 1>} : vector<1x128xi32>
    %c1_i32_1 = arith.constant 1 : i32
    %4 = vector.broadcast %c1_i32_1 : i32 to vector<1x128xi32>
    %5 = arith.andi %3, %4 : vector<1x128xi32>
    %c0_i32 = arith.constant 0 : i32
    %6 = vector.broadcast %c0_i32 : i32 to vector<1x128xi32>
    %7 = arith.cmpi eq, %5, %6 : vector<1x128xi32>
    %8 = arith.mulf %2, %2 : vector<1x128xf32>
    %cst = arith.constant 1.000000e+00 : f32
    %9 = vector.broadcast %cst : f32 to vector<1x128xf32>
    %10 = arith.subf %9, %8 : vector<1x128xf32>
    %cst_2 = arith.constant 2.500000e+00 : f32
    %11 = vector.broadcast %cst_2 : f32 to vector<1x128xf32>
    %12 = arith.mulf %11, %10 : vector<1x128xf32>
    %13 = arith.mulf %12, %0 : vector<1x128xf32>
    %14 = arith.subf %13, %2 : vector<1x128xf32>
    %15 = arith.select %7, %1, %14 : vector<1x128xi1>, vector<1x128xf32>
    %c0_3 = arith.constant 0 : index
    %c0_4 = arith.constant 0 : index
    %16 = vector.load %arg2[%c0_3, %c0_4] : memref<1x128xf32, #tpu.memory_space<vmem>>, vector<1x128xf32>
    tpu.vector_store %arg2[%c0_3, %c0_4], %15 {strides = array<i32>} : memref<1x128xf32, #tpu.memory_space<vmem>>, vector<1x128xf32>,
    return
  }
  func.func @transform_0(%arg0: i32) -> (i32, i32) {
    %c0_i32 = arith.constant 0 : i32
    %c0_i32_0 = arith.constant 0 : i32
    return %arg0, %c0_i32 : i32, i32
  }
  func.func @transform_1(%arg0: i32) -> (i32, i32) {
    %c0_i32 = arith.constant 0 : i32
    %c0_i32_0 = arith.constant 0 : i32
    return %arg0, %c0_i32 : i32, i32
  }
}

</mosaic_0001>

<bundles_post_ra>
// kernel: tpu_custom_call.1
= control target key start
LH: loop header
LB: loop body
LE: loop exit
PB: predicated region body
PF: predicated region fallthrough
CT: control target
= control target key end

     0   :  { %6 = vsyncpa [#allocation3], 0  ;;  %s132_s0 = inlined_call_operand.hbm [shape: f32[1,128], index: 0, kind: input, shape index: {}]   ;;  %s133_s1 = inlined_call_operand.hbm [shape: f32[1,128], index: 1, kind: output, shape index: {}]  }
   0x1   :  { %7 = vsyncpa [#allocation4], 0  ;;  %s13_s8 = sshll.u32 %s132_s0, 4  ;;  %s112_s9 = smov [#allocation2]   ;;  %s14_s8 = int_to_ptr.hbm [resolvable:$true] %s13_s8 }
   0x2   :  { %s15_s10 = sshll.u32 %s112_s9, 4  ;;  %s16_s10 = int_to_ptr.vmem [resolvable:$true] %s15_s10 }
   0x3   :  { %18 = dma.hbm_to_vmem [thread:$0]  %s14_s8, 16, %s16_s10, [#allocation3]  }
   0x4   :  { %108 = dma.done.wait [#allocation3], 16  }
   0x5   :  { %109 = vsyncadd [#allocation3], 4294967280  ;;  %v23_v0 = vld [vmem:[#allocation2] sm:$0x1]  ;;  %s113_s11 = smov 1   ;;  %s114_s12 = smov 127   ;;  %v28_v1 = vlaneseq }
   0x6   :  { %26 = vrot.lane.b32.xlu0 %v23_v0, %s113_s11  ;;  %s115_s0 = smov [#allocation5]   ;;  %s46_s16 = sshll.u32 %s133_s1, 4  ;;  %s47_s16 = int_to_ptr.hbm [resolvable:$true] %s46_s16 }
   0x7   :  { %v29_v3 = vand.u32 127, %v28_v1  ;;  %s44_s13 = sshll.u32 %s115_s0, 4  ;;  %s45_s13 = int_to_ptr.vmem [resolvable:$true] %s44_s13 }
   0x9   :  { %v30_v6 = vand.u32 1, %v29_v3 }
   0xb   :  { %vm31_vm0 = vcmp.eq.s32.totalorder %v30_v6, 0 }
   0xe   :  { %24 = vrot.lane.b32.xlu0 %v23_v0, %s114_s12 }
  0x78   :  { %v27_v2 = vpop.permute.xlu0 %26 }
  0x79   :  { %v32_v4 = vmul.f32 %v27_v2, %v27_v2 }
  0x7b   :  { %v33_v5 = vsub.f32 1.0, %v32_v4 }
  0x7d   :  { %v34_v7 = vmul.f32 2.5, %v33_v5 }
  0x7f   :  { %v35_v8 = vmul.f32 %v34_v7, %v23_v0 }
  0x80   :  { %v25_v9 = vpop.permute.xlu0 %24 }
  0x81   :  { %v36_v10 = vsub.f32 %v35_v8, %v27_v2 }
  0x83   :  { %v37_v11 = vsel %vm31_vm0, %v25_v9, %v36_v10 }
  0x84   :  { %38 = vst [vmem:[#allocation5] sm:$0x1] %v37_v11 }
  0x85   :  { %49 = dma.vmem_to_hbm [thread:$0]  %s45_s13, 16, %s47_s16, [#allocation4]  }
  0x86   :  { %110 = dma.done.wait [#allocation4], 16  }
  0x87   :  { %111 = vsyncadd [#allocation4], 4294967280 }
  0x88   :  { %54 = vsyncpa [#allocation3], 1 }
  0x89   :  { %55 = vsyncpa [#allocation4], 1 }

</bundles_post_ra>
